<compile_context>
chip_gen: v7x
topology: tpu7x:2x2x1
jax: 0.10.0
libtpu: 0.0.40
codegen_flags: <defaults>
</compile_context>

<pallas_src>
import functools

import jax
import jax.numpy as jnp
from jax import lax
from jax.experimental import pallas as pl
from jax.experimental.pallas import tpu as pltpu


def _round_up(x, m):
    return ((x + m - 1) // m) * m


def _choose_tile_p(P, C, itemsize):
    """Largest lane-dense pixel tile: ~4 MiB per logits+labels block keeps even
    the v5e 16 MiB default scoped VMEM comfortable (double-buffered) while
    amortizing the ~0.35 us/step grid overhead."""
    p128 = _round_up(P, 128)
    c_pad = _round_up(C, 8)
    bytes_per_lane = c_pad * max(int(itemsize), 1) + 8 * 4  # logits col + padded int32 label col
    budget = max(128, ((4 << 20) // bytes_per_lane) // 128 * 128)
    return min(p128, budget, 65536)


def _loss_stats_kernel(logits_ref, labels_ref, out_ref,
                       ids_ref, ce_acc, tp_acc, pred_acc, tgt_acc,
                       *, num_classes, true_p, tiles_per_split, has_tail):
    s = pl.program_id(1)   # pixel-split index (v7x megacore balance)
    j = pl.program_id(2)   # pixel-tile index within this (batch, split)

    @pl.when(j == 0)
    def _init():
        # Hoist the class-id iota off the per-step VALU path.
        ids_ref[...] = lax.broadcasted_iota(jnp.int32, ids_ref.shape, 0)
        ce_acc[...] = jnp.zeros_like(ce_acc)
        tp_acc[...] = jnp.zeros_like(tp_acc)
        pred_acc[...] = jnp.zeros_like(pred_acc)
        tgt_acc[...] = jnp.zeros_like(tgt_acc)

    x = logits_ref[...].astype(jnp.float32)        # (C, TILE_P)
    lbl = labels_ref[...].astype(jnp.int32)        # (1, TILE_P), native dtype in HBM
    class_ids = ids_ref[...]                       # (C, TILE_P) int32 (reloaded, not regenerated)
    tile_p = x.shape[1]

    if has_tail:   # trace-time: only emitted when the grid over-covers P
        lane = lax.broadcasted_iota(jnp.int32, (1, tile_p), 1)
        tile_idx = s * tiles_per_split + j
        valid = (tile_idx * tile_p + lane) < true_p            # (1, TILE_P)
        lbl = jnp.where(valid, lbl, num_classes)               # out-of-range => never matches

    tgt_f = jnp.where(class_ids == lbl, 1.0, 0.0)              # (C, TILE_P)

    # ---- cross entropy: logsumexp over classes minus target logit ----------
    row_max = jnp.max(x, axis=0, keepdims=True)                # (1, TILE_P)
    lse = row_max + jnp.log(jnp.sum(jnp.exp(x - row_max), axis=0, keepdims=True))
    tgt_logit = jnp.sum(tgt_f * x, axis=0, keepdims=True)      # (1, TILE_P)
    ce = lse - tgt_logit
    if has_tail:
        ce = jnp.where(valid, ce, 0.0)

    # ---- argmax over classes (first max wins, matching torch.argmax) -------
    is_max = x == row_max
    pred = jnp.min(jnp.where(is_max, class_ids, num_classes),
                   axis=0, keepdims=True)                      # (1, TILE_P)
    if has_tail:
        pred = jnp.where(valid, pred, num_classes)
    pred_f = jnp.where(class_ids == pred, 1.0, 0.0)            # (C, TILE_P)

    # ---- per-step lane reductions (XLU) into tiny accumulators -------------
    ce_acc[...] += jnp.sum(ce, axis=1, keepdims=True)                  # (1, 1)
    tp_acc[...] += jnp.sum(pred_f * tgt_f, axis=1, keepdims=True)      # (C, 1)
    pred_acc[...] += jnp.sum(pred_f, axis=1, keepdims=True)            # (C, 1)
    tgt_acc[...] += jnp.sum(tgt_f, axis=1, keepdims=True)              # (C, 1)

    # ---- lane-dense (C, 128) stats slab, once per (batch, split) -----------
    @pl.when(j == pl.num_programs(2) - 1)
    def _write():
        lanes = lax.broadcasted_iota(jnp.int32, out_ref.shape, 1)      # (C, 128)
        out = jnp.where(lanes == 0, tp_acc[...], 0.0)
        out = jnp.where(lanes == 1, pred_acc[...], out)
        out = jnp.where(lanes == 2, tgt_acc[...], out)
        out = jnp.where(lanes == 3, ce_acc[...], out)
        out_ref[...] = out


def combined_loss(logits, masks):
    """logits: (B, C, H, W) float, masks: (B, H, W) int -> (ce, dice_loss, final)."""
    assert logits.ndim == 4, f"logits must be (B,C,H,W), got {logits.shape}"
    assert masks.ndim == 3, f"masks must be (B,H,W), got {masks.shape}"
    B, C, H, W = logits.shape
    P = H * W
    N = B * P

    # Free reshapes only: no transpose, no pad, no dtype cast in HBM.
    x = logits.reshape(B, C, P)
    y = masks.reshape(B, 1, P)   # keep native (ideally narrow) integer dtype

    itemsize = jnp.dtype(logits.dtype).itemsize
    tile_p = _choose_tile_p(P, C, itemsize)
    num_tiles = pl.cdiv(P, tile_p)

    # v7x has 2 TensorCores sharded over "parallel" grid axes; when B alone
    # cannot feed both evenly, split the pixel-tile axis into an extra parallel
    # axis and sum the partial stats on the host.
    num_splits = 2 if (B % 2 == 1 and num_tiles >= 2) else 1
    tiles_per_split = pl.cdiv(num_tiles, num_splits)
    has_tail = (num_splits * tiles_per_split * tile_p) != P

    if num_splits == 1:
        pix_idx = lambda b, s, j: (b, 0, j)
    else:
        last_tile = num_tiles - 1
        pix_idx = lambda b, s, j: (b, 0, jnp.minimum(s * tiles_per_split + j, last_tile))

    # Explicit scoped-VMEM limit: double-buffered inputs + scratch + headroom,
    # capped at 48 MiB so the same number stays safe on v7x (64 MiB physical).
    c_pad = _round_up(C, 8)
    block_bytes = c_pad * tile_p * max(int(itemsize), 1)
    lbl_bytes = 8 * tile_p * 4
    ids_bytes = c_pad * tile_p * 4
    vmem_limit = int(min(max(4 * (block_bytes + lbl_bytes) + 2 * ids_bytes + (2 << 20),
                             32 << 20),
                         48 << 20))

    kernel = functools.partial(_loss_stats_kernel, num_classes=C, true_p=P,
                               tiles_per_split=tiles_per_split, has_tail=has_tail)

    stats = pl.pallas_call(
        kernel,
        out_shape=jax.ShapeDtypeStruct((B, num_splits, C, 128), jnp.float32),
        grid_spec=pltpu.PrefetchScalarGridSpec(
            num_scalar_prefetch=0,
            grid=(B, num_splits, tiles_per_split),
            in_specs=[pl.BlockSpec((None, C, tile_p), pix_idx),
                      pl.BlockSpec((None, 1, tile_p), pix_idx)],
            out_specs=pl.BlockSpec((None, None, C, 128), lambda b, s, j: (b, s, 0, 0)),
            scratch_shapes=[pltpu.VMEM((C, tile_p), jnp.int32),   # hoisted class-id iota
                            pltpu.VMEM((1, 1), jnp.float32),      # ce partial sum
                            pltpu.VMEM((C, 1), jnp.float32),      # tp
                            pltpu.VMEM((C, 1), jnp.float32),      # pred count
                            pltpu.VMEM((C, 1), jnp.float32)]),    # target count
        compiler_params=pltpu.CompilerParams(
            dimension_semantics=("parallel", "parallel", "arbitrary"),
            vmem_limit_bytes=vmem_limit),
    )(x, y)

    # Tiny host-side reductions over the (B, S, C, 128) per-(batch, split) partials.
    tp = jnp.sum(stats[:, :, :, 0], axis=(0, 1))        # (C,)
    pred_cnt = jnp.sum(stats[:, :, :, 1], axis=(0, 1))  # (C,)
    tgt_cnt = jnp.sum(stats[:, :, :, 2], axis=(0, 1))   # (C,)
    ce_sum = jnp.sum(stats[:, :, 0, 3])                 # scalar

    # CrossEntropyLoss(reduction='mean') over all B*H*W pixels.
    ce = ce_sum / N

    # torchmetrics Dice(average='macro', ignore_index=None):
    #   dice_c = 2*TP_c / (2*TP_c + FP_c + FN_c), averaged over classes.
    # TODO(synk): classes entirely absent from pred & target (denominator 0)
    # take zero_division=0 here; torchmetrics drops such classes from the macro
    # mean -- identical whenever every class appears, as in this synthetic test.
    fp = pred_cnt - tp
    fn = tgt_cnt - tp
    denom = 2.0 * tp + fp + fn
    dice_per_class = jnp.where(denom > 0, 2.0 * tp / jnp.maximum(denom, 1.0), 0.0)
    dice = jnp.mean(dice_per_class)
    dice_loss = 1.0 - dice
    final = ce + dice_loss
    return ce, dice_loss, final


def _reference(logits, masks):
    """Plain-JAX reference (same zero-division convention as the kernel glue)."""
    B, C, H, W = logits.shape
    logp = jax.nn.log_softmax(logits.astype(jnp.float32), axis=1)
    ce = -jnp.mean(jnp.take_along_axis(logp, masks[:, None].astype(jnp.int32), axis=1))
    pred = jnp.argmax(logits, axis=1)
    tp = jnp.array([jnp.sum((pred == c) & (masks == c)) for c in range(C)], jnp.float32)
    pc = jnp.array([jnp.sum(pred == c) for c in range(C)], jnp.float32)
    tc = jnp.array([jnp.sum(masks == c) for c in range(C)], jnp.float32)
    denom = 2.0 * tp + (pc - tp) + (tc - tp)
    dice_pc = jnp.where(denom > 0, 2.0 * tp / jnp.maximum(denom, 1.0), 0.0)
    dice_loss = 1.0 - jnp.mean(dice_pc)
    return ce, dice_loss, ce + dice_loss


if __name__ == "__main__":
    key = jax.random.PRNGKey(0)
    k_logits, k_masks = jax.random.split(key)

    # Primary check: (B, C, H, W) = (2, 4, 16, 16).
    B, C, H, W = 2, 4, 16, 16
    logits = jax.random.normal(k_logits, (B, C, H, W), dtype=jnp.float32)
    masks = jax.random.randint(k_masks, (B, H, W), 0, C, dtype=jnp.int32)

    ce, dice_loss, final = combined_loss(logits, masks)
    jax.block_until_ready((ce, dice_loss, final))
    ce_r, dl_r, fin_r = _reference(logits, masks)
    assert abs(float(ce) - float(ce_r)) < 2e-3
    assert abs(float(dice_loss) - float(dl_r)) < 2e-3
    assert abs(float(final) - float(fin_r)) < 2e-3

    # Secondary check exercising the ragged-tail path (P not a multiple of 128).
    k2l, k2m = jax.random.split(jax.random.PRNGKey(1))
    B2, C2, H2, W2 = 1, 3, 5, 5
    logits2 = jax.random.normal(k2l, (B2, C2, H2, W2), dtype=jnp.float32)
    masks2 = jax.random.randint(k2m, (B2, H2, W2), 0, C2, dtype=jnp.int32)
    ce2, dl2, fin2 = combined_loss(logits2, masks2)
    jax.block_until_ready((ce2, dl2, fin2))
    ce2_r, dl2_r, fin2_r = _reference(logits2, masks2)
    assert abs(float(ce2) - float(ce2_r)) < 2e-3
    assert abs(float(dl2) - float(dl2_r)) < 2e-3
    assert abs(float(fin2) - float(fin2_r)) < 2e-3

    print("KERNEL_OK")
</pallas_src>

<mosaic_0001>
module attributes {stable_mosaic.version = 11 : i64} {
  func.func @_loss_stats_kernel(%arg0: i32, %arg1: i32, %arg2: i32, %arg3: memref<1x4x256xf32, #tpu.memory_space<vmem>>, %arg4: memref<1x1x256xi32, #tpu.memory_space<vmem>>, %arg5: memref<1x1x4x128xf32, #tpu.memory_space<vmem>>, %arg6: memref<4x256xi32, #tpu.memory_space<vmem>>, %arg7: memref<1x1xf32, #tpu.memory_space<vmem>>, %arg8: memref<4x1xf32, #tpu.memory_space<vmem>>, %arg9: memref<4x1xf32, #tpu.memory_space<vmem>>, %arg10: memref<4x1xf32, #tpu.memory_space<vmem>>) attributes {dimension_semantics = [#tpu.dimension_semantics<parallel>, #tpu.dimension_semantics<parallel>, #tpu.dimension_semantics<arbitrary>], iteration_bounds = array<i64: 2, 1, 1>, scalar_prefetch = 0 : i64, scratch_operands = 5 : i64, tpu.core_type = #tpu.core_type<tc>, window_params = [{transform_indices = @transform_0, window_bounds = array<i64: 1, 4, 256>}, {transform_indices = @transform_1, window_bounds = array<i64: 1, 1, 256>}, {transform_indices = @transform_2, window_bounds = array<i64: 1, 1, 4, 128>}]} {
    %c0_i32 = arith.constant 0 : i32
    %0 = arith.cmpi eq, %arg2, %c0_i32 : i32
    %1 = arith.extui %0 : i1 to i32
    %c0_i32_0 = arith.constant 0 : i32
    %2 = arith.cmpi ne, %1, %c0_i32_0 : i32
    scf.if %2 {
      %61 = tpu.iota {dimensions = array<i32: 0>} : vector<4x256xi32>
      %c0_37 = arith.constant 0 : index
      %c0_38 = arith.constant 0 : index
      %62 = vector.load %arg6[%c0_37, %c0_38] : memref<4x256xi32, #tpu.memory_space<vmem>>, vector<4x256xi32>
      tpu.vector_store %arg6[%c0_37, %c0_38], %61 {strides = array<i32>} : memref<4x256xi32, #tpu.memory_space<vmem>>, vector<4x256xi32>,
      %cst_39 = arith.constant 0.000000e+00 : f32
      %63 = vector.broadcast %cst_39 : f32 to vector<1x1xf32>
      %c0_40 = arith.constant 0 : index
      %c0_41 = arith.constant 0 : index
      %64 = vector.load %arg7[%c0_40, %c0_41] : memref<1x1xf32, #tpu.memory_space<vmem>>, vector<1x1xf32>
      tpu.vector_store %arg7[%c0_40, %c0_41], %63 {strides = array<i32>} : memref<1x1xf32, #tpu.memory_space<vmem>>, vector<1x1xf32>,
      %cst_42 = arith.constant 0.000000e+00 : f32
      %65 = vector.broadcast %cst_42 : f32 to vector<4x1xf32>
      %c0_43 = arith.constant 0 : index
      %c0_44 = arith.constant 0 : index
      %66 = vector.load %arg8[%c0_43, %c0_44] : memref<4x1xf32, #tpu.memory_space<vmem>>, vector<4x1xf32>
      tpu.vector_store %arg8[%c0_43, %c0_44], %65 {strides = array<i32>} : memref<4x1xf32, #tpu.memory_space<vmem>>, vector<4x1xf32>,
      %cst_45 = arith.constant 0.000000e+00 : f32
      %67 = vector.broadcast %cst_45 : f32 to vector<4x1xf32>
      %c0_46 = arith.constant 0 : index
      %c0_47 = arith.constant 0 : index
      %68 = vector.load %arg9[%c0_46, %c0_47] : memref<4x1xf32, #tpu.memory_space<vmem>>, vector<4x1xf32>
      tpu.vector_store %arg9[%c0_46, %c0_47], %67 {strides = array<i32>} : memref<4x1xf32, #tpu.memory_space<vmem>>, vector<4x1xf32>,
      %cst_48 = arith.constant 0.000000e+00 : f32
      %69 = vector.broadcast %cst_48 : f32 to vector<4x1xf32>
      %c0_49 = arith.constant 0 : index
      %c0_50 = arith.constant 0 : index
      %70 = vector.load %arg10[%c0_49, %c0_50] : memref<4x1xf32, #tpu.memory_space<vmem>>, vector<4x1xf32>
      tpu.vector_store %arg10[%c0_49, %c0_50], %69 {strides = array<i32>} : memref<4x1xf32, #tpu.memory_space<vmem>>, vector<4x1xf32>,
    } else {
    }
    %c0 = arith.constant 0 : index
    %c0_1 = arith.constant 0 : index
    %c0_2 = arith.constant 0 : index
    %3 = vector.load %arg3[%c0, %c0_1, %c0_2] : memref<1x4x256xf32, #tpu.memory_space<vmem>>, vector<1x4x256xf32>
    %4 = vector.shape_cast %3 : vector<1x4x256xf32> to vector<4x256xf32>
    %c0_3 = arith.constant 0 : index
    %c0_4 = arith.constant 0 : index
    %c0_5 = arith.constant 0 : index
    %5 = vector.load %arg4[%c0_3, %c0_4, %c0_5] : memref<1x1x256xi32, #tpu.memory_space<vmem>>, vector<1x1x256xi32>
    %6 = vector.shape_cast %5 : vector<1x1x256xi32> to vector<1x256xi32>
    %c0_6 = arith.constant 0 : index
    %c0_7 = arith.constant 0 : index
    %7 = vector.load %arg6[%c0_6, %c0_7] : memref<4x256xi32, #tpu.memory_space<vmem>>, vector<4x256xi32>
    %8 = vector.broadcast %6 : vector<1x256xi32> to vector<4x256xi32>
    %9 = arith.cmpi eq, %7, %8 : vector<4x256xi32>
    %cst = arith.constant 1.000000e+00 : f32
    %cst_8 = arith.constant 0.000000e+00 : f32
    %10 = vector.broadcast %cst : f32 to vector<4x256xf32>
    %11 = vector.broadcast %cst_8 : f32 to vector<4x256xf32>
    %12 = arith.select %9, %10, %11 : vector<4x256xi1>, vector<4x256xf32>
    %cst_9 = arith.constant dense<0xFF800000> : vector<256xf32>
    %13 = vector.multi_reduction <maximumf>, %4, %cst_9 [0] : vector<4x256xf32> to vector<256xf32>
    %14 = vector.shape_cast %13 : vector<256xf32> to vector<1x256xf32>
    %15 = vector.broadcast %14 : vector<1x256xf32> to vector<4x256xf32>
    %16 = arith.subf %4, %15 : vector<4x256xf32>
    %17 = math.exp %16 : vector<4x256xf32>
    %cst_10 = arith.constant dense<0.000000e+00> : vector<256xf32>
    %18 = vector.multi_reduction <add>, %17, %cst_10 [0] : vector<4x256xf32> to vector<256xf32>
    %19 = vector.shape_cast %18 : vector<256xf32> to vector<1x256xf32>
    %20 = math.log %19 : vector<1x256xf32>
    %21 = arith.addf %14, %20 : vector<1x256xf32>
    %22 = arith.mulf %12, %4 : vector<4x256xf32>
    %cst_11 = arith.constant dense<0.000000e+00> : vector<256xf32>
    %23 = vector.multi_reduction <add>, %22, %cst_11 [0] : vector<4x256xf32> to vector<256xf32>
    %24 = vector.shape_cast %23 : vector<256xf32> to vector<1x256xf32>
    %25 = arith.subf %21, %24 : vector<1x256xf32>
    %26 = vector.broadcast %14 : vector<1x256xf32> to vector<4x256xf32>
    %27 = arith.cmpf oeq, %4, %26 : vector<4x256xf32>
    %c4_i32 = arith.constant 4 : i32
    %28 = vector.broadcast %c4_i32 : i32 to vector<4x256xi32>
    %29 = arith.select %27, %7, %28 : vector<4x256xi1>, vector<4x256xi32>
    %cst_12 = arith.constant dense<2147483647> : vector<256xi32>
    %30 = vector.multi_reduction <minsi>, %29, %cst_12 [0] : vector<4x256xi32> to vector<256xi32>
    %31 = vector.shape_cast %30 : vector<256xi32> to vector<1x256xi32>
    %32 = vector.broadcast %31 : vector<1x256xi32> to vector<4x256xi32>
    %33 = arith.cmpi eq, %7, %32 : vector<4x256xi32>
    %cst_13 = arith.constant 1.000000e+00 : f32
    %cst_14 = arith.constant 0.000000e+00 : f32
    %34 = vector.broadcast %cst_13 : f32 to vector<4x256xf32>
    %35 = vector.broadcast %cst_14 : f32 to vector<4x256xf32>
    %36 = arith.select %33, %34, %35 : vector<4x256xi1>, vector<4x256xf32>
    %c0_15 = arith.constant 0 : index
    %c0_16 = arith.constant 0 : index
    %37 = vector.load %arg7[%c0_15, %c0_16] : memref<1x1xf32, #tpu.memory_space<vmem>>, vector<1x1xf32>
    %cst_17 = arith.constant dense<0.000000e+00> : vector<1xf32>
    %38 = vector.multi_reduction <add>, %25, %cst_17 [1] : vector<1x256xf32> to vector<1xf32>
    %39 = vector.shape_cast %38 : vector<1xf32> to vector<1x1xf32>
    %40 = arith.addf %37, %39 : vector<1x1xf32>
    %c0_18 = arith.constant 0 : index
    %c0_19 = arith.constant 0 : index
    %41 = vector.load %arg7[%c0_18, %c0_19] : memref<1x1xf32, #tpu.memory_space<vmem>>, vector<1x1xf32>
    tpu.vector_store %arg7[%c0_18, %c0_19], %40 {strides = array<i32>} : memref<1x1xf32, #tpu.memory_space<vmem>>, vector<1x1xf32>,
    %c0_20 = arith.constant 0 : index
    %c0_21 = arith.constant 0 : index
    %42 = vector.load %arg8[%c0_20, %c0_21] : memref<4x1xf32, #tpu.memory_space<vmem>>, vector<4x1xf32>
    %43 = arith.mulf %36, %12 : vector<4x256xf32>
    %cst_22 = arith.constant dense<0.000000e+00> : vector<4xf32>
    %44 = vector.multi_reduction <add>, %43, %cst_22 [1] : vector<4x256xf32> to vector<4xf32>
    %45 = vector.shape_cast %44 : vector<4xf32> to vector<4x1xf32>
    %46 = arith.addf %42, %45 : vector<4x1xf32>
    %c0_23 = arith.constant 0 : index
    %c0_24 = arith.constant 0 : index
    %47 = vector.load %arg8[%c0_23, %c0_24] : memref<4x1xf32, #tpu.memory_space<vmem>>, vector<4x1xf32>
    tpu.vector_store %arg8[%c0_23, %c0_24], %46 {strides = array<i32>} : memref<4x1xf32, #tpu.memory_space<vmem>>, vector<4x1xf32>,
    %c0_25 = arith.constant 0 : index
    %c0_26 = arith.constant 0 : index
    %48 = vector.load %arg9[%c0_25, %c0_26] : memref<4x1xf32, #tpu.memory_space<vmem>>, vector<4x1xf32>
    %cst_27 = arith.constant dense<0.000000e+00> : vector<4xf32>
    %49 = vector.multi_reduction <add>, %36, %cst_27 [1] : vector<4x256xf32> to vector<4xf32>
    %50 = vector.shape_cast %49 : vector<4xf32> to vector<4x1xf32>
    %51 = arith.addf %48, %50 : vector<4x1xf32>
    %c0_28 = arith.constant 0 : index
    %c0_29 = arith.constant 0 : index
    %52 = vector.load %arg9[%c0_28, %c0_29] : memref<4x1xf32, #tpu.memory_space<vmem>>, vector<4x1xf32>
    tpu.vector_store %arg9[%c0_28, %c0_29], %51 {strides = array<i32>} : memref<4x1xf32, #tpu.memory_space<vmem>>, vector<4x1xf32>,
    %c0_30 = arith.constant 0 : index
    %c0_31 = arith.constant 0 : index
    %53 = vector.load %arg10[%c0_30, %c0_31] : memref<4x1xf32, #tpu.memory_space<vmem>>, vector<4x1xf32>
    %cst_32 = arith.constant dense<0.000000e+00> : vector<4xf32>
    %54 = vector.multi_reduction <add>, %12, %cst_32 [1] : vector<4x256xf32> to vector<4xf32>
    %55 = vector.shape_cast %54 : vector<4xf32> to vector<4x1xf32>
    %56 = arith.addf %53, %55 : vector<4x1xf32>
    %c0_33 = arith.constant 0 : index
    %c0_34 = arith.constant 0 : index
    %57 = vector.load %arg10[%c0_33, %c0_34] : memref<4x1xf32, #tpu.memory_space<vmem>>, vector<4x1xf32>
    tpu.vector_store %arg10[%c0_33, %c0_34], %56 {strides = array<i32>} : memref<4x1xf32, #tpu.memory_space<vmem>>, vector<4x1xf32>,
    %c0_i32_35 = arith.constant 0 : i32
    %58 = arith.cmpi eq, %arg2, %c0_i32_35 : i32
    %59 = arith.extui %58 : i1 to i32
    %c0_i32_36 = arith.constant 0 : i32
    %60 = arith.cmpi ne, %59, %c0_i32_36 : i32
    scf.if %60 {
      %61 = tpu.iota {dimensions = array<i32: 1>} : vector<4x128xi32>
      %c0_i32_37 = arith.constant 0 : i32
      %62 = vector.broadcast %c0_i32_37 : i32 to vector<4x128xi32>
      %63 = arith.cmpi eq, %61, %62 : vector<4x128xi32>
      %c0_38 = arith.constant 0 : index
      %c0_39 = arith.constant 0 : index
      %64 = vector.load %arg8[%c0_38, %c0_39] : memref<4x1xf32, #tpu.memory_space<vmem>>, vector<4x1xf32>
      %cst_40 = arith.constant 0.000000e+00 : f32
      %65 = vector.shape_cast %64 : vector<4x1xf32> to vector<4x1xf32>
      %66 = vector.broadcast %65 : vector<4x1xf32> to vector<4x128xf32>
      %67 = vector.broadcast %cst_40 : f32 to vector<4x128xf32>
      %68 = arith.select %63, %66, %67 : vector<4x128xi1>, vector<4x128xf32>
      %c1_i32 = arith.constant 1 : i32
      %69 = vector.broadcast %c1_i32 : i32 to vector<4x128xi32>
      %70 = arith.cmpi eq, %61, %69 : vector<4x128xi32>
      %c0_41 = arith.constant 0 : index
      %c0_42 = arith.constant 0 : index
      %71 = vector.load %arg9[%c0_41, %c0_42] : memref<4x1xf32, #tpu.memory_space<vmem>>, vector<4x1xf32>
      %72 = vector.shape_cast %71 : vector<4x1xf32> to vector<4x1xf32>
      %73 = vector.broadcast %72 : vector<4x1xf32> to vector<4x128xf32>
      %74 = arith.select %70, %73, %68 : vector<4x128xi1>, vector<4x128xf32>
      %c2_i32 = arith.constant 2 : i32
      %75 = vector.broadcast %c2_i32 : i32 to vector<4x128xi32>
      %76 = arith.cmpi eq, %61, %75 : vector<4x128xi32>
      %c0_43 = arith.constant 0 : index
      %c0_44 = arith.constant 0 : index
      %77 = vector.load %arg10[%c0_43, %c0_44] : memref<4x1xf32, #tpu.memory_space<vmem>>, vector<4x1xf32>
      %78 = vector.shape_cast %77 : vector<4x1xf32> to vector<4x1xf32>
      %79 = vector.broadcast %78 : vector<4x1xf32> to vector<4x128xf32>
      %80 = arith.select %76, %79, %74 : vector<4x128xi1>, vector<4x128xf32>
      %c3_i32 = arith.constant 3 : i32
      %81 = vector.broadcast %c3_i32 : i32 to vector<4x128xi32>
      %82 = arith.cmpi eq, %61, %81 : vector<4x128xi32>
      %c0_45 = arith.constant 0 : index
      %c0_46 = arith.constant 0 : index
      %83 = vector.load %arg7[%c0_45, %c0_46] : memref<1x1xf32, #tpu.memory_space<vmem>>, vector<1x1xf32>
      %84 = vector.shape_cast %83 : vector<1x1xf32> to vector<1x1xf32>
      %85 = vector.broadcast %84 : vector<1x1xf32> to vector<4x128xf32>
      %86 = arith.select %82, %85, %80 : vector<4x128xi1>, vector<4x128xf32>
      %c0_47 = arith.constant 0 : index
      %c0_48 = arith.constant 0 : index
      %c0_49 = arith.constant 0 : index
      %c0_50 = arith.constant 0 : index
      %87 = vector.load %arg5[%c0_47, %c0_48, %c0_49, %c0_50] : memref<1x1x4x128xf32, #tpu.memory_space<vmem>>, vector<1x1x4x128xf32>
      %88 = vector.shape_cast %87 : vector<1x1x4x128xf32> to vector<4x128xf32>
      %89 = vector.shape_cast %86 : vector<4x128xf32> to vector<1x1x4x128xf32>
      tpu.vector_store %arg5[%c0_47, %c0_48, %c0_49, %c0_50], %89 {strides = array<i32>} : memref<1x1x4x128xf32, #tpu.memory_space<vmem>>, vector<1x1x4x128xf32>,
    } else {
    }
    return
  }
  func.func @transform_0(%arg0: i32, %arg1: i32, %arg2: i32) -> (i32, i32, i32) {
    %c0_i32 = arith.constant 0 : i32
    %c0_i32_0 = arith.constant 0 : i32
    return %arg0, %c0_i32, %arg2 : i32, i32, i32
  }
  func.func @transform_1(%arg0: i32, %arg1: i32, %arg2: i32) -> (i32, i32, i32) {
    %c0_i32 = arith.constant 0 : i32
    %c0_i32_0 = arith.constant 0 : i32
    return %arg0, %c0_i32, %arg2 : i32, i32, i32
  }
  func.func @transform_2(%arg0: i32, %arg1: i32, %arg2: i32) -> (i32, i32, i32, i32) {
    %c0_i32 = arith.constant 0 : i32
    %c0_i32_0 = arith.constant 0 : i32
    %c0_i32_1 = arith.constant 0 : i32
    return %arg0, %arg1, %c0_i32, %c0_i32_0 : i32, i32, i32, i32
  }
}

</mosaic_0001>

<bundles_post_ra>
// kernel: tpu_custom_call.1
= control target key start
LH: loop header
LB: loop body
LE: loop exit
PB: predicated region body
PF: predicated region fallthrough
CT: control target
= control target key end

     0   :  { %7 = vsyncpa [#allocation8], 0  ;;  %s1090_s0 = inlined_call_operand.hbm [shape: f32[2,4,256], index: 0, kind: input, shape index: {}]   ;;  %s1091_s1 = inlined_call_operand.hbm [shape: s32[2,1,256], index: 1, kind: input, shape index: {}]   ;;  %s1092_s2 = inlined_call_operand.hbm [shape: f32[2,1,4,128], index: 2, kind: output, shape index: {}]  }
   0x1   :  { %9 = vsyncpa [#allocation8 + $0x1], 0 }
   0x2   :  { %10 = vsyncpa [#allocation11], 0 }
   0x3   :  { %12 = vsyncpa [#allocation11 + $0x1], 0 }
   0x4   :  { %13 = vsyncpa [#allocation9], 0 }
   0x5   :  { %15 = vsyncpa [#allocation9 + $0x1], 0  ;;  %s836_s9 = smov 0   ;;  %s838_s10 = smov 0  }
   0x6   :  { %s840_s11 = smov 0   ;;  %s842_s12 = smov 0  }
   0x7   :  { %s844_s13 = smov 0   ;;  %s846_s14 = smov 0  }
   0x8 LB: > { %s567_s15 = sadd.s32 4294967295, %s813_s14   ;;  %s568_s16 = sadd.s32 4294967294, %s813_s14   ;;  %s813_s14 = sphi %s846_s14, %s21_s14   ;;  %s809_s13 = sphi %s844_s13, %s1112_s13   ;;  %s805_s12 = sphi %s842_s12, %s1111_s12   ;;  %s801_s11 = sphi %s840_s11, %s1110_s11   ;;  %s797_s10 = sphi %s838_s10, %s1109_s10   ;;  %s793_s9 = sphi %s836_s9, %s1108_s9  }
   0x9   : > { %s40_s17 = sadd.s32 1, %s809_s13  ;;  %s49_s18 = sadd.s32 1, %s801_s11 }
   0xa   : > { %p42_p0 = scmp.ge.s32.totalorder %s40_s17, 2  ;;  %p56_p1 = scmp.ne.s32.totalorder %s801_s11, %s797_s10 }
   0xb   : > { %p57_p2 = scmp.eq.s32.totalorder %s813_s14, 0  ;;  %p62_p3 = scmp.ne.s32.totalorder %s797_s10, %s793_s9 }
   0xc   : > { %s1114_s17 = smov (%p42_p0, %s40_s17), 0  ;;  %p63_p5 = scmp.eq.s32.totalorder %s567_s15, 0 }
   0xd   : > { %p877_p4 = por %p57_p2, %p56_p1  ;;  %s44_s20 = ssub.s32 %s809_s13, %s1114_s17 }
   0xe   : > { %p116_p6 = scmp.eq.s32.totalorder %s567_s15, 1  ;;  %p47_p7 = scmp.eq.s32.totalorder %s44_s20, 0 }
   0xf   : > { %p883_p8 = por %p63_p5, %p62_p3  ;;  %p122_p10 = scmp.eq.s32.totalorder %s568_s16, 1 }
  0x10   : > { %p887_p9 = por %p116_p6, %p56_p1  ;;  %p605_p13 = scmp.lt.s32.totalorder %s813_s14, 2 }
  0x11   : > { %s1096_s21 = scalar_select %p883_p8, 1, 0 }
  0x12   : > { %s1097_s22 = scalar_select %p887_p9, 1, 0 }
  0x13   : > { %s892_s23 = scalar_select %p47_p7, %s801_s11, %s49_s18  }
  0x14   : > { %p894_p11 = por %p122_p10, %p62_p3  ;;  %s901_s25 = sand.u32 1, %s801_s11  }
  0x15   : > { %s571_s26 = sshll.u32 %s901_s25, 3  ;;  %s586_s27 = sshll.u32 %s809_s13, 7 }
  0x16   : > { %s1098_s24 = scalar_select %p894_p11, 1, 0 }
  0x17   : > { %s908_s30 = scalar_lea.hbm %s1090_s0, %s586_s27  ;;  %s146_s3 = scalar_lea.vmem [#allocation7], %s571_s26 }
  0x18   : > { %s156_s4 = sshll.u32 %s146_s3, 4  ;;  %p914_p0 = pnand %p605_p13, %p877_p4  ;;  %s910_s4 = int_to_ptr.vmem [resolvable:$true] %s156_s4 }
  0x19   : > { %s143_s6 = scalar_lea.sflag [#allocation8], %s901_s25  ;;  %s667_s7 = scalar_lea.hbm %s908_s30, 128 }
  0x1a   : > { %p668_p3 = scmp.ne.s32.totalorder %s908_s30, %s667_s7  ;;  %p669_p5 = pneg %p914_p0 }
  0x1b   : > { %s672_s16 = scalar_lea.hbm %s1090_s0, 256  ;;  %p673_p4 = scmp.lt.u32.totalorder %s908_s30, %s1090_s0 }
  0x1c   : > { %p670_p6 = pnand %p669_p5, %p668_p3  ;;  %p674_p10 = scmp.lt.u32.totalorder %s672_s16, %s667_s7 }
  0x1d   : > { %p676_p12 = scmp.lt.u32.totalorder %s667_s7, %s908_s30 }
  0x1e   : > { %p671_p7 = pneg %p670_p6  ;;  %p675_p13 = por %p674_p10, %p673_p4 }
  0x20   : > { %p677_p1 = por %p676_p12, %p675_p13 }
  0x22   : > { %p678_p2 = pnand %p677_p1, %p671_p7 }
  0x24   : > { %681 = shalt.err (!%p678_p2)
}
  0x25   : > { %s682_s20 = scalar_lea.vmem %s910_s4, 128  ;;  %s815_s26 = smov [#allocation7]  }
  0x26   : > { %p683_p3 = scmp.ne.s32.totalorder %s910_s4, %s682_s20  ;;  %s687_s27 = sshll.u32 %s815_s26, 4  ;;  %s688_s27 = int_to_ptr.vmem [resolvable:$false] %s687_s27 }
  0x27   : > { %s689_s28 = scalar_lea.vmem %s688_s27, 256  ;;  %p690_p9 = scmp.lt.s32.totalorder %s910_s4, %s688_s27 }
  0x28   : > { %p685_p6 = pnand %p683_p3, %p669_p5  ;;  %p691_p4 = scmp.lt.s32.totalorder %s689_s28, %s682_s20 }
  0x2a   : > { %p686_p11 = pneg %p685_p6  ;;  %p692_p10 = por %p691_p4, %p690_p9 }
  0x2c   : > { %p693_p12 = pnand %p692_p10, %p686_p11 }
  0x2e   : > { %696 = shalt.err (!%p693_p12)
}
  0x2f   : > { %597 = dma.hbm_to_vmem [thread:$0]  (!%p914_p0), %s908_s30, 128, %s910_s4, %s143_s6  }
  0x30   : > { %p1100_p1 = scmp.lt.s32.totalorder %s813_s14, 3  ;;  %p1101_p2 = scmp.ge.s32.totalorder %s813_s14, 1 }
  0x31   : > { %s574_s3 = sshll.u32 %s901_s25, 1  ;;  %s587_s7 = sshll.u32 %s809_s13, 5 }
  0x32   : > { %p950_p7 = pnand %p1101_p2, %p1100_p1  ;;  %s959_s16 = scalar_lea.hbm %s1091_s1, %s587_s7 }
  0x33   : > { %s167_s18 = scalar_lea.vmem [#allocation10], %s574_s3  ;;  %s164_s30 = scalar_lea.sflag [#allocation11], %s901_s25 }
  0x34   : > { %s1102_s29 = scalar_select %p950_p7, 1, 0 }
  0x35   : > { %s177_s19 = sshll.u32 %s167_s18, 4  ;;  %s697_s4 = scalar_lea.hbm %s959_s16, 32  ;;  %s178_s19 = int_to_ptr.vmem [resolvable:$true] %s177_s19 }
  0x36   : > { %p698_p9 = scmp.ne.s32.totalorder %s959_s16, %s697_s4  ;;  %s702_s26 = scalar_lea.hbm %s1091_s1, 64 }
  0x37   : > { %p703_p3 = scmp.lt.u32.totalorder %s959_s16, %s1091_s1  ;;  %p704_p6 = scmp.lt.u32.totalorder %s702_s26, %s697_s4 }
  0x38   : > { %p700_p11 = pnand %p698_p9, %p669_p5  ;;  %p706_p10 = scmp.lt.u32.totalorder %s697_s4, %s959_s16 }
  0x39   : > { %p705_p4 = por %p704_p6, %p703_p3 }
  0x3a   : > { %p701_p13 = pneg %p700_p11 }
  0x3b   : > { %p707_p12 = por %p706_p10, %p705_p4 }
  0x3d   : > { %p708_p1 = pnand %p707_p12, %p701_p13 }
  0x3f   : > { %711 = shalt.err (!%p708_p1)
}
  0x40   : > { %s712_s25 = scalar_lea.vmem %s178_s19, 32  ;;  %s816_s3 = smov [#allocation10]  }
  0x41   : > { %p713_p2 = scmp.ne.s32.totalorder %s178_s19, %s712_s25  ;;  %s717_s7 = sshll.u32 %s816_s3, 4  ;;  %s718_s7 = int_to_ptr.vmem [resolvable:$false] %s717_s7 }
  0x42   : > { %s719_s8 = scalar_lea.vmem %s718_s7, 64  ;;  %p720_p8 = scmp.lt.s32.totalorder %s178_s19, %s718_s7 }
  0x43   : > { %p715_p9 = pnand %p713_p2, %p669_p5  ;;  %p721_p7 = scmp.lt.s32.totalorder %s719_s8, %s712_s25 }
  0x45   : > { %p716_p11 = pneg %p715_p9  ;;  %p722_p3 = por %p721_p7, %p720_p8 }
  0x47   : > { %p723_p6 = pnand %p722_p3, %p716_p11 }
  0x49   : > { %726 = shalt.err (!%p723_p6)
}
  0x4a   : > { %600 = dma.hbm_to_vmem [thread:$0]  (!%p914_p0), %s959_s16, 32, %s178_s19, %s164_s30  }
  0x4b   : > { %p1103_p13 = scmp.ne.s32.totalorder %s1102_s29, 0 }
  0x4c   : > { %s984_s15 = sand.u32 (!%p1103_p13), 1, %s797_s10   ;;  %p1104_p5 = scmp.ne.s32.totalorder (!%p1103_p13), %s1096_s21, 0 }
  0x4d   : > { %186 = sbr.rel (%p1103_p13) target bundleno = 450 (0x1c2), region = 28  ;;  %s578_s18 = sshll.u32 (!%p1103_p13), %s984_s15, 3 }
  0x4e   : > { %s189_s4 = scalar_lea.sflag (!%p1103_p13), [#allocation8], %s984_s15  ;;  %s192_s6 = scalar_lea.vmem (!%p1103_p13), [#allocation7], %s578_s18 }
  0x54   : > { %780 = dma.done.wait (%p1104_p5), %s189_s4, 128  }
  0x55   : > { %782 = vsyncadd (%p1104_p5), %s189_s4, 4294967168  ;;  %s579_s5 = sshll.u32 %s984_s15, 1  ;;  %s198_s29 = scalar_lea.sflag [#allocation11], %s984_s15 }
  0x56   : > { %s201_s16 = scalar_lea.vmem [#allocation10], %s579_s5 }
  0x57   : > { %784 = dma.done.wait (%p1104_p5), %s198_s29, 32  }
  0x58   : > { %786 = vsyncadd (%p1104_p5), %s198_s29, 4294967264  ;;  %v233_v0 = vlaneseq  ;;  %v817_v1 = vmov 839922192   ;;  %vm245_vm0 = vcmask 3072   ;;  %v818_v4 = vmov 0.0   ;;  %v249_v9 = vld [vmem:[%s192_s6] sm:$0xff] }
  0x59   : > { %v236_v2 = vunpack.c.l.s4 %v817_v1  ;;  %246 = vst.msk [vmem:[#allocation4] sm:$0xf] %vm245_vm0, %v818_v4  ;;  %247 = vst.msk [vmem:[#allocation5] sm:$0xf] %vm245_vm0, %v818_v4  ;;  %vm266_vm1 = vcmask 1043456   ;;  %v264_v13 = vcombine.high %v249_v9, %v249_v9  ;;  %vm243_vm11 = vcmask 0  }
  0x5a   : > { %v234_v3 = vshrl.u32 %v233_v0, 7  ;;  %248 = vst.msk [vmem:[#allocation6] sm:$0xf] %vm245_vm0, %v818_v4  ;;  %v250_v10 = vld [vmem:[%s201_s16] sm:$0x3]  ;;  %v267_v14 = vsel %vm266_vm1, %v249_v9, -inf }
  0x5b   : > { %v237_v5 = vunpack.c.0.s8 %v236_v2  ;;  %v268_v15 = vrot.slane %v267_v14, 4  ;;  %v274_v18 = vsel %vm266_vm1, %v264_v13, -inf  ;;  %244 = vst.msk [vmem:[#allocation3] sm:$0x1] %vm243_vm11, %v818_v4  ;;  %s580_s21 = sshll.u32 %s984_s15, 2  ;;  %s583_s19 = sshll.u32 %s805_s12, 6 }
  0x5c   : > { %v254_v6 = vsub.s32 0, %v234_v3  ;;  %v258_v7 = vsub.s32 1, %v234_v3  ;;  %v275_v20 = vrot.slane %v274_v18, 4  ;;  %s226_s30 = scalar_lea.vmem [#allocation12], %s580_s21  ;;  %s1041_s28 = scalar_lea.hbm %s1092_s2, %s583_s19 }
  0x5d   : > { %v240_v8 = vsub.s32 %v237_v5, %v234_v3  ;;  %v269_v19 = vmax.f32 %v267_v14, %v268_v15  ;;  %s456_s20 = sshll.u32 %s226_s30, 4  ;;  %s442_s25 = scalar_lea.sflag [#allocation9], %s984_s15  ;;  %s1043_s20 = int_to_ptr.vmem [resolvable:$true] %s456_s20 }
  0x5e   : > { %v255_v11 = vrot.slane %v250_v10, %v254_v6  ;;  %v259_v12 = vrot.slane %v250_v10, %v258_v7  ;;  %v276_v23 = vmax.f32 %v274_v18, %v275_v20  ;;  %s727_s3 = scalar_lea.vmem %s1043_s20, 64  ;;  %p1105_p0 = scmp.ne.s32.totalorder %s1097_s22, 0 }
  0x5f   : > { %v241_v16 = vrot.slane %v234_v3, %v240_v8  ;;  %v270_v22 = vrot.slane %v269_v19, 2  ;;  %p728_p8 = scmp.ne.s32.totalorder %s1043_s20, %s727_s3  ;;  %s820_s12 = smov [#allocation12]  }
  0x60   : > { %v260_v17 = vcombine.low %v255_v11, %v259_v12  ;;  %v277_v27 = vrot.slane %v276_v23, 2  ;;  %s731_s7 = sshll.u32 %s820_s12, 4  ;;  %s732_s7 = int_to_ptr.vmem [resolvable:$false] %s731_s7 }
  0x61   : > { %v271_v26 = vmax.f32 %v269_v19, %v270_v22  ;;  %p729_p7 = pnand %p728_p8, %p1105_p0  ;;  %s733_s8 = scalar_lea.vmem %s732_s7, 128 }
  0x62   : > { %vm261_vm2 = vcmp.eq.s32.totalorder %v241_v16, %v260_v17  ;;  %v278_v30 = vmax.f32 %v276_v23, %v277_v27  ;;  %p734_p10 = scmp.lt.s32.totalorder %s1043_s20, %s732_s7  ;;  %p735_p12 = scmp.lt.s32.totalorder %s733_s8, %s727_s3 }
  0x63   : > { %v262_v21 = vsel %vm261_vm2, 1.0, %v818_v4  ;;  %v272_v29 = vrot.slane %v271_v26, 1  ;;  %p730_p4 = pneg %p729_p7 }
  0x64   : > { %v390_v24 = vcombine.high %v262_v21, %v262_v21  ;;  %v392_v25 = vsel %vm266_vm1, %v262_v21, 0.0  ;;  %v279_v33 = vrot.slane %v278_v30, 1  ;;  %v311_v48 = vmul.f32 %v262_v21, %v249_v9  ;;  %p736_p1 = por %p735_p12, %p734_p10 }
  0x65   : > { %v1010_v32 = vmax.f32 %v271_v26, %v272_v29 }
  0x66   : > { %v393_v28 = vsel %vm266_vm1, %v390_v24, 0.0  ;;  %v1012_v34 = vmax.f32 %v278_v30, %v279_v33  ;;  %v313_v55 = vcombine.high %v311_v48, %v311_v48  ;;  %v315_v60 = vsel %vm266_vm1, %v311_v48, 0.0  ;;  %p737_p2 = pnand %p736_p1, %p730_p4 }
  0x67   : > { %v394_v31 = vadd.f32 %v393_v28, %v392_v25  ;;  %v316_v3 = vrot.slane %v315_v60, 4 }
  0x68   : > { %v283_v35 = vcombine.low %v1010_v32, %v1012_v34  ;;  %v322_v2 = vsel %vm266_vm1, %v313_v55, 0.0 }
  0x69   : > { %395 = vadd.xlane.f32.xlu1 %v394_v31  ;;  %v323_v10 = vrot.slane %v322_v2, 4  ;;  %v317_v15 = vadd.f32 %v316_v3, %v315_v60  ;;  %v403_v60 = vand.u32 127, %v233_v0 }
  0x6a   : > { %vm331_vm3 = vcmp.eq.f32.partialorder %v249_v9, %v283_v35  ;;  %v285_v36 = vsub.f32 %v249_v9, %v283_v35 }
  0x6b   : > { %v332_v37 = vsel %vm331_vm3, %v241_v16, 4  ;;  %v324_v22 = vadd.f32 %v323_v10, %v322_v2  ;;  %v318_v25 = vrot.slane %v317_v15, 2  ;;  %vm404_vm12 = vcmp.eq.s32.totalorder %v403_v60, 0 }
  0x6c   : > { %v333_v38 = vcombine.high %v332_v37, %v332_v37  ;;  %v334_v39 = vsel %vm266_vm1, %v332_v37, 2147483647  ;;  %v286_v40 = vmul.f32 1.442695, %v285_v36  ;;  %vm412_vm13 = vcmp.eq.s32.totalorder %v403_v60, 1 }
  0x6d   : > { %v335_v41 = vrot.slane %v334_v39, 4  ;;  %v325_v28 = vrot.slane %v324_v22, 2  ;;  %v319_v29 = vadd.f32 %v318_v25, %v317_v15  ;;  %vm420_vm14 = vcmp.eq.s32.totalorder %v403_v60, 2 }
  0x6e   : > { %v344_v42 = vsel %vm266_vm1, %v333_v38, 2147483647  ;;  %661 = vpow2.f32 %v286_v40  ;;  %vm428_vm15 = vcmp.eq.s32.totalorder %v403_v60, 3 }
  0x6f   : > { %vm336_vm4 = vcmp.lt.s32.totalorder %v334_v39, %v335_v41  ;;  %v345_v43 = vrot.slane %v344_v42, 4  ;;  %v326_v30 = vadd.f32 %v325_v28, %v324_v22  ;;  %v320_v31 = vrot.slane %v319_v29, 1 }
  0x70   : > { %v337_v44 = vsel %vm336_vm4, %v334_v39, %v335_v41 }
  0x71   : > { %v338_v45 = vrot.slane %v337_v44, 2  ;;  %vm346_vm5 = vcmp.lt.s32.totalorder %v344_v42, %v345_v43  ;;  %v327_v33 = vrot.slane %v326_v30, 1  ;;  %v321_v37 = vadd.f32 %v320_v31, %v319_v29 }
  0x72   : > { %v347_v46 = vsel %vm346_vm5, %v344_v42, %v345_v43 }
  0x73   : > { %vm339_vm6 = vcmp.lt.s32.totalorder %v337_v44, %v338_v45  ;;  %v348_v47 = vrot.slane %v347_v46, 2  ;;  %v328_v41 = vadd.f32 %v327_v33, %v326_v30 }
  0x74   : > { %v340_v49 = vsel %vm339_vm6, %v337_v44, %v338_v45 }
  0x75   : > { %v341_v50 = vrot.slane %v340_v49, 1  ;;  %vm349_vm7 = vcmp.lt.s32.totalorder %v347_v46, %v348_v47 }
  0x76   : > { %v350_v51 = vsel %vm349_vm7, %v347_v46, %v348_v47  ;;  %v819_v46 = vmov 0   ;;  %v388_v47 = vld [vmem:[#allocation6] sm:$0xf] }
  0x77   : > { %vm342_vm8 = vcmp.lt.s32.totalorder %v340_v49, %v341_v50  ;;  %v351_v52 = vrot.slane %v350_v51, 1  ;;  %658 = vset.pattern.permute.xlu0 %v819_v46  ;;  %659 = vset.pattern.permute.xlu1 %v819_v46 }
  0x78   : > { %v662_v53 = vpop.eup %661  ;;  %v343_v54 = vsel %vm342_vm8, %v340_v49, %v341_v50 }
  0x79   : > { %vm352_vm9 = vcmp.lt.s32.totalorder %v350_v51, %v351_v52  ;;  %v289_v56 = vcombine.high %v662_v53, %v662_v53  ;;  %v291_v57 = vsel %vm266_vm1, %v662_v53, 0.0 }
  0x7a   : > { %v353_v58 = vsel %vm352_vm9, %v350_v51, %v351_v52  ;;  %v292_v59 = vrot.slane %v291_v57, 4 }
  0x7b   : > { %v354_v61 = vcombine.low %v343_v54, %v353_v58  ;;  %v298_v62 = vsel %vm266_vm1, %v289_v56, 0.0  ;;  %v357_v56 = vld [vmem:[#allocation3] sm:$0x1] }
  0x7c   : > { %v293_v63 = vadd.f32 %v292_v59, %v291_v57  ;;  %v299_v1 = vrot.slane %v298_v62, 4 }
  0x7d   : > { %vm355_vm10 = vcmp.eq.s32.totalorder %v241_v16, %v354_v61 }
  0x7e   : > { %v356_v5 = vsel %vm355_vm10, 1.0, %v818_v4  ;;  %v294_v6 = vrot.slane %v293_v63, 2  ;;  %v300_v7 = vadd.f32 %v299_v1, %v298_v62 }
  0x7f   : > { %v365_v8 = vmul.f32 %v356_v5, %v262_v21  ;;  %v379_v9 = vcombine.high %v356_v5, %v356_v5  ;;  %v381_v16 = vsel %vm266_vm1, %v356_v5, 0.0 }
  0x80   : > { %v295_v11 = vadd.f32 %v294_v6, %v293_v63  ;;  %v301_v12 = vrot.slane %v300_v7, 2 }
  0x81   : > { %v367_v13 = vcombine.high %v365_v8, %v365_v8  ;;  %v369_v14 = vsel %vm266_vm1, %v365_v8, 0.0  ;;  %v382_v20 = vsel %vm266_vm1, %v379_v9, 0.0 }
  0x82   : > { %v296_v17 = vrot.slane %v295_v11, 1  ;;  %v302_v18 = vadd.f32 %v301_v12, %v300_v7  ;;  %v383_v26 = vadd.f32 %v382_v20, %v381_v16 }
  0x83   : > { %v370_v19 = vsel %vm266_vm1, %v367_v13, 0.0 }
  0x84   : > { %v371_v23 = vadd.f32 %v370_v19, %v369_v14  ;;  %v297_v24 = vadd.f32 %v296_v17, %v295_v11  ;;  %v303_v21 = vrot.slane %v302_v18, 1 }
  0x86   : > { %372 = vadd.xlane.f32.xlu0 %v371_v23  ;;  %v304_v27 = vadd.f32 %v303_v21, %v302_v18  ;;  %663 = vlog2.f32 %v297_v24 }
  0x88   : > { %665 = vlog2.f32 %v304_v27 }
  0x8a   : > { %384 = vadd.xlane.f32.xlu0 %v383_v26 }
  0x90   : > { %v664_v35 = vpop.eup %663 }
  0x91   : > { %v306_v36 = vmul.f32 0.6931472, %v664_v35 }
  0x92   : > { %v666_v38 = vpop.eup %665 }
  0x93   : > { %v308_v39 = vmul.f32 0.6931472, %v666_v38  ;;  %v309_v40 = vadd.f32 %v306_v36, %v1010_v32  ;;  %v364_v32 = vld [vmem:[#allocation4] sm:$0xf] }
  0x95   : > { %v310_v42 = vadd.f32 %v308_v39, %v1012_v34  ;;  %v329_v43 = vsub.f32 %v309_v40, %v321_v37  ;;  %v377_v34 = vld [vmem:[#allocation5] sm:$0xf] }
  0x97   : > { %v330_v44 = vsub.f32 %v310_v42, %v328_v41 }
  0x99   : > { %v358_v45 = vadd.f32 %v330_v44, %v329_v43 }
  0x9b   : > { %359 = vadd.xlane.f32.xlu1 %v358_v45 }
  0xf6   : > { %v396_v48 = vpop.xlane.xlu1 %395 }
  0xf7   : > { %v397_v49 = vadd.f32 %v396_v48, %v388_v47 }
  0xf9   : > { %398 = vst.msk [vmem:[#allocation6] sm:$0xf] %vm245_vm0, %v397_v49 }
 0x100   : > { %v421_v4 = vld [vmem:[#allocation6] sm:$0xf] }
 0x113   : > { %v373_v50 = vpop.xlane.xlu0 %372 }
 0x114   : > { %v374_v51 = vadd.f32 %v373_v50, %v364_v32 }
 0x116   : > { %376 = vst.msk [vmem:[#allocation4] sm:$0xf] %vm245_vm0, %v374_v51 }
 0x117   : > { %v385_v52 = vpop.xlane.xlu0 %384 }
 0x118   : > { %v386_v53 = vadd.f32 %v385_v52, %v377_v34 }
 0x11a   : > { %387 = vst.msk [vmem:[#allocation5] sm:$0xf] %vm245_vm0, %v386_v53 }
 0x11d   : > { %v405_v54 = vld [vmem:[#allocation4] sm:$0xf] }
 0x11e   : > { %408 = vperm.xlu0 %658, %v405_v54  }
 0x121   : > { %v413_v55 = vld [vmem:[#allocation5] sm:$0xf] }
 0x122   : > { %416 = vperm.xlu1 %659, %v413_v55  }
 0x126   : > { %424 = vperm.xlu1 %659, %v421_v4  }
 0x128   : > { %v360_v57 = vpop.xlane.xlu1 %359 }
 0x129   : > { %v361_v58 = vadd.f32 %v360_v57, %v357_v56 }
 0x12b   : > { %363 = vst.msk [vmem:[#allocation3] sm:$0x1] %vm243_vm11, %v361_v58 }
 0x132   : > { %v581_v59 = vld [vmem:[#allocation3] ss:$0 sm:$0xff] }
 0x133   : > { %436 = vperm.xlu1 %659, %v581_v59  }
 0x19d   : > { %v409_v62 = vpop.permute.xlu0 %408 }
 0x19e   : > { %v411_v63 = vsel %vm404_vm12, %v409_v62, 0.0 }
 0x1a1   : > { %v417_v61 = vpop.permute.xlu1 %416 }
 0x1a2   : > { %v419_v2 = vsel %vm412_vm13, %v417_v61, %v411_v63 }
 0x1a5   : > { %v425_v1 = vpop.permute.xlu1 %424 }
 0x1a6   : > { %v427_v3 = vsel %vm420_vm14, %v425_v1, %v419_v2 }
 0x1b2   : > { %v437_v5 = vpop.permute.xlu1 %436 }
 0x1b3   : > { %v439_v0 = vsel %vm428_vm15, %v437_v5, %v427_v3 }
 0x1b4   : > { %440 = vst [vmem:[%s226_s30] sm:$0xf] %v439_v0 }
 0x1b5   : > { %740 = shalt.err (!%p737_p2)
}
 0x1b6   : > { %s741_s15 = scalar_lea.hbm %s1041_s28, 64  ;;  %s745_s6 = scalar_lea.hbm %s1092_s2, 128 }
 0x1b7   : > { %p742_p9 = scmp.ne.s32.totalorder %s1041_s28, %s741_s15  ;;  %p746_p6 = scmp.lt.u32.totalorder %s1041_s28, %s1092_s2 }
 0x1b8   : > { %p747_p13 = scmp.lt.u32.totalorder %s745_s6, %s741_s15  ;;  %p749_p8 = scmp.lt.u32.totalorder %s741_s15, %s1041_s28 }
 0x1b9   : > { %p743_p11 = pnand %p742_p9, %p1105_p0 }
 0x1ba   : > { %p748_p5 = por %p747_p13, %p746_p6 }
 0x1bb   : > { %p744_p3 = pneg %p743_p11 }
 0x1bc   : > { %p750_p7 = por %p749_p8, %p748_p5 }
 0x1be   : > { %p751_p4 = pnand %p750_p7, %p744_p3 }
 0x1c0   : > { %754 = shalt.err (!%p751_p4)
}
 0x1c1   : > { %592 = dma.vmem_to_hbm [thread:$0]  (%p1105_p0), %s1043_s20, 64, %s1041_s28, %s442_s25  }
 0x1c2 PF: > { %s468_s16 = sand.u32 1, %s793_s9   ;;  %p1106_p10 = scmp.ne.s32.totalorder %s1098_s24, 0 }
 0x1c3   : > { %p1107_p12 = scmp.ge.s32.totalorder %s813_s14, 2  ;;  %s469_s21 = scalar_lea.sflag [#allocation9], %s468_s16 }
 0x1c5   : > { %p602_p1 = pnand %p1107_p12, %p1106_p10 }
 0x1c7   : > { %788 = dma.done.wait (!%p602_p1), %s469_s21, 64  }
 0x1c8   : > { %790 = vsyncadd (!%p602_p1), %s469_s21, 4294967232  ;;  %s21_s14 = sadd.s32 1, %s813_s14   ;;  %s1108_s9 = smov %s797_s10 }
 0x1c9   : > { %p18_p2 = scmp.ge.s32.totalorder %s21_s14, 4   ;;  %s1109_s10 = smov %s801_s11 }
 0x1ca   : > { %s1110_s11 = smov %s892_s23  ;;  %s1111_s12 = smov %s809_s13 }
 0x1cb   : > { %s1112_s13 = smov %s1114_s17  ;;  %20 = sbr.rel (!%p18_p2) target bundleno = 8 (0x8), region = 94 }
 0x1d2   :  { %474 = vsyncpa [#allocation8], 1 }
 0x1d3   :  { %476 = vsyncpa [#allocation8 + $0x1], 1 }
 0x1d4   :  { %477 = vsyncpa [#allocation11], 1 }
 0x1d5   :  { %479 = vsyncpa [#allocation11 + $0x1], 1 }
 0x1d6   :  { %480 = vsyncpa [#allocation9], 1 }
 0x1d7   :  { %482 = vsyncpa [#allocation9 + $0x1], 1 }

</bundles_post_ra>
